<compile_context>
chip_gen: v7x
topology: tpu7x:2x2x1
jax: 0.10.0
libtpu: 0.0.40
codegen_flags: <defaults>
</compile_context>

<pallas_src>
import jax
import jax.numpy as jnp
from jax import lax
from jax.experimental import pallas as pl
from jax.experimental.pallas import tpu as pltpu

_INV_SQRT2 = 0.7071067811865476


def _mlp_kernel(x_ref, w1_ref, b1_ref, w2_ref, b2_ref, o_ref, acc_ref):
    h_idx = pl.program_id(1)

    x = x_ref[...]                                              # (TM, D)
    # fc chunk: (TM, D) @ (D, TH) -> (TM, TH), f32 accumulation on the MXU.
    h = jnp.dot(x, w1_ref[...], preferred_element_type=jnp.float32)
    h = h + b1_ref[...].astype(jnp.float32)
    # Exact (erf-based) GELU, matching torch.nn.GELU() default semantics.
    # TODO(synk): if the VALU slot binds for narrow d_model, switch to
    # tanh-approx GELU (EUP slot) at the cost of exact-erf parity.
    h = 0.5 * h * (1.0 + lax.erf(h * _INV_SQRT2))
    # Cast back to the input dtype so the second matmul runs the MXU fast path
    # (bf16 in / f32 accumulate) when activations & weights are bf16.
    contrib = jnp.dot(h.astype(x.dtype), w2_ref[...],
                      preferred_element_type=jnp.float32)

    # First-chunk write: saves one (TM, D) f32 zero store and one load per
    # row tile (relieves the vst slot, scarcest on v5e).
    @pl.when(h_idx == 0)
    def _first():
        acc_ref[...] = contrib

    @pl.when(h_idx > 0)
    def _accumulate():
        acc_ref[...] += contrib

    @pl.when(h_idx == pl.num_programs(1) - 1)
    def _finalize():
        out = acc_ref[...] + b2_ref[...].astype(jnp.float32)
        o_ref[...] = out.astype(o_ref.dtype)


def _sublane_align(dtype):
    """Native sublane tile height for the dtype (8 f32 / 16 bf16 / 32 int8)."""
    return {4: 8, 2: 16, 1: 32}.get(jnp.dtype(dtype).itemsize, 8)


def _vmem_budget_and_targets():
    """(vmem budget bytes, tm_target, th_target) for the local chip."""
    vmem_cap = 64 * 1024 * 1024
    try:
        info = pltpu.get_tpu_info()
        vmem_cap = int(getattr(info, "vmem_capacity_bytes", vmem_cap))
    except Exception:
        pass
    if vmem_cap >= 128 * 1024 * 1024:
        # v5e / v6e class: 128 MiB physical VMEM; leave headroom for Mosaic
        # internal scratch.  Large TM pushes past the weight-streaming knee.
        return 100 * 1024 * 1024, 1024, 1024
    # v7x class: 64 MiB per TensorCore; knee is lower (~310 flops/byte) so
    # TM=512 / TH=512 is compute-bound while leaving ~15% headroom.
    return int(0.85 * vmem_cap), 512, 512


def _vmem_bytes(tm, th, d, act_itm, w_itm):
    return (
        2 * tm * d * act_itm            # x row tiles (double-buffered)
        + 2 * tm * d * act_itm          # out tiles (double-buffered)
        + tm * d * 4                    # f32 accumulator scratch
        + 2 * d * th * w_itm            # W1 chunks (double-buffered)
        + 2 * th * d * w_itm            # W2 chunks (double-buffered)
        + 2 * th * w_itm + 2 * d * w_itm  # bias chunks
        + 2 * tm * th * 4               # (TM, TH) GELU intermediate + slack
    )


def _select_tiles(m, d, hidden, act_dtype, w_dtype):
    """Pick (tm, th, vmem_limit) so the working set fits the chip's budget."""
    act_itm = jnp.dtype(act_dtype).itemsize
    w_itm = jnp.dtype(w_dtype).itemsize
    align = _sublane_align(act_dtype)
    budget, tm_target, th_target = _vmem_budget_and_targets()

    m_ceil = -(-m // align) * align   # rows rounded up to the sublane tile

    # Hidden-chunk candidates: lane-aligned divisors of hidden, descending.
    th_start = (min(th_target, hidden) // 128) * 128
    th_cands = [t for t in range(th_start, 0, -128) if hidden % t == 0]
    if not th_cands:
        th_cands = [hidden]           # hidden not 128-aligned: one whole chunk

    for th in th_cands:
        # Solve the budget for the largest sublane-aligned tm.
        per_tm = 4 * d * act_itm + d * 4 + 2 * th * 4
        fixed = 4 * d * th * w_itm + 2 * th * w_itm + 2 * d * w_itm
        if budget <= fixed:
            continue
        tm_max = (budget - fixed) // per_tm
        tm = min(tm_target, m_ceil, (tm_max // align) * align)
        if tm >= align:
            return int(tm), int(th), int(budget)

    # Last resort: minimum tiles (tiny d_model always lands here or above).
    return align, th_cands[-1], int(budget)


def mlp_pallas(x, w1, b1, w2, b2):
    """x: (..., D); w1: (D, 4D); b1: (1, 4D); w2: (4D, D); b2: (1, D)."""
    d_model = x.shape[-1]
    hidden = w1.shape[1]
    lead = x.shape[:-1]
    x2d = x.reshape(-1, d_model)
    m = x2d.shape[0]

    tm, th, vmem_limit = _select_tiles(m, d_model, hidden, x2d.dtype, w1.dtype)

    grid_m = pl.cdiv(m, tm)           # no jnp.pad: Pallas masks the last tile
    grid = (grid_m, hidden // th)

    # Advisory cost estimate: weights are re-streamed once per row tile.
    w_bytes = (w1.size * w1.dtype.itemsize + b1.size * b1.dtype.itemsize
               + w2.size * w2.dtype.itemsize + b2.size * b2.dtype.itemsize)
    bytes_accessed = (2 * x2d.size * x2d.dtype.itemsize   # x in + out
                      + grid_m * w_bytes)
    cost = pl.CostEstimate(
        flops=4 * m * d_model * hidden,
        transcendentals=m * hidden,
        bytes_accessed=int(bytes_accessed),
    )

    out = pl.pallas_call(
        _mlp_kernel,
        out_shape=jax.ShapeDtypeStruct((m, d_model), x.dtype),
        grid_spec=pltpu.PrefetchScalarGridSpec(
            num_scalar_prefetch=0,
            grid=grid,
            in_specs=[
                pl.BlockSpec((tm, d_model), lambda i, h: (i, 0)),   # x row tile
                pl.BlockSpec((d_model, th), lambda i, h: (0, h)),   # W1 chunk
                pl.BlockSpec((1, th), lambda i, h: (0, h)),         # b1 chunk
                pl.BlockSpec((th, d_model), lambda i, h: (h, 0)),   # W2 chunk
                pl.BlockSpec((1, d_model), lambda i, h: (0, 0)),    # b2 resident
            ],
            out_specs=pl.BlockSpec((tm, d_model), lambda i, h: (i, 0)),
            scratch_shapes=[pltpu.VMEM((tm, d_model), jnp.float32)],
        ),
        compiler_params=pltpu.CompilerParams(
            dimension_semantics=("parallel", "arbitrary"),
            vmem_limit_bytes=vmem_limit,
        ),
        cost_estimate=cost,
    )(x2d, w1, b1, w2, b2)

    return out.reshape(*lead, d_model)


def _reference_mlp(x, w1, b1, w2, b2):
    h = x @ w1 + b1[0]
    h = 0.5 * h * (1.0 + lax.erf(h / jnp.sqrt(2.0)))
    return h @ w2 + b2[0]


if __name__ == "__main__":
    # Small demo shapes consistent with the module: batch=2, seq=8, d_model=32.
    # Note: d_model=32 < 128 lanes means masked stores here; production shapes
    # should keep the last dim a multiple of 128 for lane-dense stores.
    batch, seq, d_model = 2, 8, 32
    hidden = 4 * d_model

    key = jax.random.PRNGKey(0)
    kx, k1, kb1, k2, kb2 = jax.random.split(key, 5)

    x = jax.random.normal(kx, (batch, seq, d_model), dtype=jnp.float32)
    # Deterministic synthetic parameters (fan-in scaled, like nn.Linear init).
    w1 = jax.random.normal(k1, (d_model, hidden), dtype=jnp.float32) / jnp.sqrt(d_model)
    b1 = jax.random.normal(kb1, (1, hidden), dtype=jnp.float32) * 0.01
    w2 = jax.random.normal(k2, (hidden, d_model), dtype=jnp.float32) / jnp.sqrt(hidden)
    b2 = jax.random.normal(kb2, (1, d_model), dtype=jnp.float32) * 0.01

    out = mlp_pallas(x, w1, b1, w2, b2)
    jax.block_until_ready(out)

    ref = _reference_mlp(x.reshape(-1, d_model), w1, b1, w2, b2).reshape(
        batch, seq, d_model
    )
    assert out.shape == (batch, seq, d_model)
    assert jnp.allclose(out, ref, atol=1e-4, rtol=1e-4)

    print("KERNEL_OK")
</pallas_src>

<mosaic_0001>
module attributes {stable_mosaic.version = 11 : i64} {
  func.func @_mlp_kernel(%arg0: i32, %arg1: i32, %arg2: memref<16x32xf32, #tpu.memory_space<vmem>>, %arg3: memref<32x128xf32, #tpu.memory_space<vmem>>, %arg4: memref<1x128xf32, #tpu.memory_space<vmem>>, %arg5: memref<128x32xf32, #tpu.memory_space<vmem>>, %arg6: memref<1x32xf32, #tpu.memory_space<vmem>>, %arg7: memref<16x32xf32, #tpu.memory_space<vmem>>, %arg8: memref<16x32xf32, #tpu.memory_space<vmem>>) attributes {dimension_semantics = [#tpu.dimension_semantics<parallel>, #tpu.dimension_semantics<arbitrary>], iteration_bounds = array<i64: 1, 1>, scalar_prefetch = 0 : i64, scratch_operands = 1 : i64, tpu.core_type = #tpu.core_type<tc>, window_params = [{transform_indices = @transform_0, window_bounds = array<i64: 16, 32>}, {transform_indices = @transform_1, window_bounds = array<i64: 32, 128>}, {transform_indices = @transform_2, window_bounds = array<i64: 1, 128>}, {transform_indices = @transform_3, window_bounds = array<i64: 128, 32>}, {pipeline_mode = #tpu.pipeline_mode<synchronous>, transform_indices = @transform_4, window_bounds = array<i64: 1, 32>}, {transform_indices = @transform_5, window_bounds = array<i64: 16, 32>}]} {
    %c0 = arith.constant 0 : index
    %c0_0 = arith.constant 0 : index
    %0 = vector.load %arg2[%c0, %c0_0] : memref<16x32xf32, #tpu.memory_space<vmem>>, vector<16x32xf32>
    %c0_1 = arith.constant 0 : index
    %c0_2 = arith.constant 0 : index
    %1 = vector.load %arg3[%c0_1, %c0_2] : memref<32x128xf32, #tpu.memory_space<vmem>>, vector<32x128xf32>
    %cst = arith.constant dense<0.000000e+00> : vector<16x128xf32>
    %2 = tpu.matmul %0, %1, %cst {dimension_numbers = #tpu.dot_dimension_numbers<[1], [0], [0], [1], [0, 0, 1, 1], [], []>} : vector<16x32xf32>, vector<32x128xf32>, vector<16x128xf32> -> vector<16x128xf32>
    %c0_3 = arith.constant 0 : index
    %c0_4 = arith.constant 0 : index
    %3 = vector.load %arg4[%c0_3, %c0_4] : memref<1x128xf32, #tpu.memory_space<vmem>>, vector<1x128xf32>
    %4 = vector.broadcast %3 : vector<1x128xf32> to vector<16x128xf32>
    %5 = arith.addf %2, %4 : vector<16x128xf32>
    %cst_5 = arith.constant 5.000000e-01 : f32
    %6 = vector.broadcast %cst_5 : f32 to vector<16x128xf32>
    %7 = arith.mulf %6, %5 : vector<16x128xf32>
    %cst_6 = arith.constant 0.707106769 : f32
    %8 = vector.broadcast %cst_6 : f32 to vector<16x128xf32>
    %9 = arith.mulf %5, %8 : vector<16x128xf32>
    %10 = math.erf %9 : vector<16x128xf32>
    %cst_7 = arith.constant 1.000000e+00 : f32
    %11 = vector.broadcast %cst_7 : f32 to vector<16x128xf32>
    %12 = arith.addf %11, %10 : vector<16x128xf32>
    %13 = arith.mulf %7, %12 : vector<16x128xf32>
    %c0_8 = arith.constant 0 : index
    %c0_9 = arith.constant 0 : index
    %14 = vector.load %arg5[%c0_8, %c0_9] : memref<128x32xf32, #tpu.memory_space<vmem>>, vector<128x32xf32>
    %cst_10 = arith.constant dense<0.000000e+00> : vector<16x32xf32>
    %15 = tpu.matmul %13, %14, %cst_10 {dimension_numbers = #tpu.dot_dimension_numbers<[1], [0], [0], [1], [0, 0, 1, 1], [], []>} : vector<16x128xf32>, vector<128x32xf32>, vector<16x32xf32> -> vector<16x32xf32>
    %c0_i32 = arith.constant 0 : i32
    %16 = arith.cmpi eq, %arg1, %c0_i32 : i32
    %17 = arith.extui %16 : i1 to i32
    %c0_i32_11 = arith.constant 0 : i32
    %18 = arith.cmpi ne, %17, %c0_i32_11 : i32
    scf.if %18 {
      %c0_16 = arith.constant 0 : index
      %c0_17 = arith.constant 0 : index
      %25 = vector.load %arg8[%c0_16, %c0_17] : memref<16x32xf32, #tpu.memory_space<vmem>>, vector<16x32xf32>
      tpu.vector_store %arg8[%c0_16, %c0_17], %15 {strides = array<i32>} : memref<16x32xf32, #tpu.memory_space<vmem>>, vector<16x32xf32>,
    } else {
    }
    %c0_i32_12 = arith.constant 0 : i32
    %19 = arith.cmpi sgt, %arg1, %c0_i32_12 : i32
    %20 = arith.extui %19 : i1 to i32
    %c0_i32_13 = arith.constant 0 : i32
    %21 = arith.cmpi ne, %20, %c0_i32_13 : i32
    scf.if %21 {
      %c0_16 = arith.constant 0 : index
      %c0_17 = arith.constant 0 : index
      %25 = vector.load %arg8[%c0_16, %c0_17] : memref<16x32xf32, #tpu.memory_space<vmem>>, vector<16x32xf32>
      %26 = arith.addf %25, %15 : vector<16x32xf32>
      %c0_18 = arith.constant 0 : index
      %c0_19 = arith.constant 0 : index
      %27 = vector.load %arg8[%c0_18, %c0_19] : memref<16x32xf32, #tpu.memory_space<vmem>>, vector<16x32xf32>
      tpu.vector_store %arg8[%c0_18, %c0_19], %26 {strides = array<i32>} : memref<16x32xf32, #tpu.memory_space<vmem>>, vector<16x32xf32>,
    } else {
    }
    %c0_i32_14 = arith.constant 0 : i32
    %22 = arith.cmpi eq, %arg1, %c0_i32_14 : i32
    %23 = arith.extui %22 : i1 to i32
    %c0_i32_15 = arith.constant 0 : i32
    %24 = arith.cmpi ne, %23, %c0_i32_15 : i32
    scf.if %24 {
      %c0_16 = arith.constant 0 : index
      %c0_17 = arith.constant 0 : index
      %25 = vector.load %arg8[%c0_16, %c0_17] : memref<16x32xf32, #tpu.memory_space<vmem>>, vector<16x32xf32>
      %c0_18 = arith.constant 0 : index
      %c0_19 = arith.constant 0 : index
      %26 = vector.load %arg6[%c0_18, %c0_19] : memref<1x32xf32, #tpu.memory_space<vmem>>, vector<1x32xf32>
      %27 = vector.broadcast %26 : vector<1x32xf32> to vector<16x32xf32>
      %28 = arith.addf %25, %27 : vector<16x32xf32>
      %c0_20 = arith.constant 0 : index
      %c0_21 = arith.constant 0 : index
      %29 = vector.load %arg7[%c0_20, %c0_21] : memref<16x32xf32, #tpu.memory_space<vmem>>, vector<16x32xf32>
      tpu.vector_store %arg7[%c0_20, %c0_21], %28 {strides = array<i32>} : memref<16x32xf32, #tpu.memory_space<vmem>>, vector<16x32xf32>,
    } else {
    }
    return
  }
  func.func @transform_0(%arg0: i32, %arg1: i32) -> (i32, i32) {
    %c0_i32 = arith.constant 0 : i32
    %c0_i32_0 = arith.constant 0 : i32
    return %arg0, %c0_i32 : i32, i32
  }
  func.func @transform_1(%arg0: i32, %arg1: i32) -> (i32, i32) {
    %c0_i32 = arith.constant 0 : i32
    %c0_i32_0 = arith.constant 0 : i32
    return %c0_i32, %arg1 : i32, i32
  }
  func.func @transform_2(%arg0: i32, %arg1: i32) -> (i32, i32) {
    %c0_i32 = arith.constant 0 : i32
    %c0_i32_0 = arith.constant 0 : i32
    return %c0_i32, %arg1 : i32, i32
  }
  func.func @transform_3(%arg0: i32, %arg1: i32) -> (i32, i32) {
    %c0_i32 = arith.constant 0 : i32
    %c0_i32_0 = arith.constant 0 : i32
    return %arg1, %c0_i32 : i32, i32
  }
  func.func @transform_4(%arg0: i32, %arg1: i32) -> (i32, i32) {
    %c0_i32 = arith.constant 0 : i32
    %c0_i32_0 = arith.constant 0 : i32
    %c0_i32_1 = arith.constant 0 : i32
    return %c0_i32, %c0_i32_0 : i32, i32
  }
  func.func @transform_5(%arg0: i32, %arg1: i32) -> (i32, i32) {
    %c0_i32 = arith.constant 0 : i32
    %c0_i32_0 = arith.constant 0 : i32
    return %arg0, %c0_i32 : i32, i32
  }
}

</mosaic_0001>

<bundles_post_ra>
// kernel: tpu_custom_call.1
= control target key start
LH: loop header
LB: loop body
LE: loop exit
PB: predicated region body
PF: predicated region fallthrough
CT: control target
= control target key end

     0   :  { %vm34_vm0 = vcmask 261120   ;;  %s533_s0 = inlined_call_operand.vmem [shape: f32[16,32], index: 0, kind: input, shape index: {}]   ;;  %s534_s1 = inlined_call_operand.vmem [shape: f32[32,128], index: 1, kind: input, shape index: {}]   ;;  %s535_s2 = inlined_call_operand.vmem [shape: f32[1,128], index: 2, kind: input, shape index: {}]   ;;  %s536_s3 = inlined_call_operand.vmem [shape: f32[128,32], index: 3, kind: input, shape index: {}]   ;;  %s537_s4 = inlined_call_operand.vmem [shape: f32[1,32], index: 4, kind: input, shape index: {}]   ;;  %s538_s5 = inlined_call_operand.hbm [shape: f32[16,32], index: 5, kind: output, shape index: {}]  }
   0x1   :  { %v23_v0 = vld [vmem:[%s534_s1] sm:$0xff]  ;;  %v24_v1 = vld [vmem:[%s534_s1 + $0x8] sm:$0xff]  ;;  %v25_v2 = vld [vmem:[%s534_s1 + $0x10] sm:$0xff] }
   0x2   :  { %v339_v3 = vpack.c.bf16 %v24_v1, %v23_v0  ;;  %v26_v4 = vld [vmem:[%s534_s1 + $0x18] sm:$0xff]  ;;  %v21_v5 = vld [vmem:[%s533_s0] sm:$0xff]  ;;  %v127_v8 = vld [vmem:[%s536_s3 + $0x8] sm:$0xff] }
   0x3   :  { %v343_v6 = vpack.c.bf16 %v26_v4, %v25_v2  ;;  %301 = vmatprep.mubr.msk.f32.mxu0 %vm34_vm0, %v21_v5  ;;  %v126_v7 = vld [vmem:[%s536_s3] sm:$0xff]  ;;  %v128_v9 = vld [vmem:[%s536_s3 + $0x10] sm:$0xff]  ;;  %v129_v11 = vld [vmem:[%s536_s3 + $0x18] sm:$0xff] }
   0x4   :  { %340 = vmatprep.subr.bf16.mxu0 %v339_v3  ;;  %v347_v10 = vpack.c.bf16 %v127_v8, %v126_v7  ;;  %v351_v12 = vpack.c.bf16 %v129_v11, %v128_v9  ;;  %v130_v13 = vld [vmem:[%s536_s3 + $0x20] sm:$0xff]  ;;  %v131_v14 = vld [vmem:[%s536_s3 + $0x28] sm:$0xff] }
   0x5   :  { %342 = vmatpush3.bf16.msra.mxu0 %v339_v3 }
   0x6   :  { %10 = vsyncpa [#allocation4], 0  ;;  %344 = vmatprep.subr.bf16.mxu0 %v343_v6  ;;  %348 = vmatprep.subr.bf16.mxu1 %v347_v10  ;;  %v355_v15 = vpack.c.bf16 %v131_v14, %v130_v13  ;;  %v22_v16 = vld [vmem:[%s533_s0 + $0x8] sm:$0xff]  ;;  %v132_v17 = vld [vmem:[%s536_s3 + $0x30] sm:$0xff]  ;;  %s410_s11 = smov [#allocation3]  }
   0x7   :  { %350 = vmatpush3.bf16.msra.mxu1 %v347_v10  ;;  %v133_v18 = vld [vmem:[%s536_s3 + $0x38] sm:$0xff]  ;;  %v134_v20 = vld [vmem:[%s536_s3 + $0x40] sm:$0xff]  ;;  %v135_v21 = vld [vmem:[%s536_s3 + $0x48] sm:$0xff]  ;;  %s254_s12 = sshll.u32 %s410_s11, 4  ;;  %s255_s12 = int_to_ptr.vmem [resolvable:$true] %s254_s12 }
   0x8   :  { %352 = vmatprep.subr.bf16.mxu1 %v351_v12  ;;  %v359_v19 = vpack.c.bf16 %v133_v18, %v132_v17  ;;  %v363_v22 = vpack.c.bf16 %v135_v21, %v134_v20  ;;  %v136_v23 = vld [vmem:[%s536_s3 + $0x50] sm:$0xff]  ;;  %v137_v24 = vld [vmem:[%s536_s3 + $0x58] sm:$0xff]  ;;  %v138_v26 = vld [vmem:[%s536_s3 + $0x60] sm:$0xff]  ;;  %s386_s13 = scalar_lea.vmem %s255_s12, 256  ;;  %p391_p1 = scmp.lt.s32.totalorder %s255_s12, %s255_s12 }
   0x9   :  { %346 = vmatpush3.bf16.msra.mxu0 %v343_v6  ;;  %v367_v25 = vpack.c.bf16 %v137_v24, %v136_v23  ;;  %v139_v27 = vld [vmem:[%s536_s3 + $0x68] sm:$0xff]  ;;  %v140_v29 = vld [vmem:[%s536_s3 + $0x70] sm:$0xff]  ;;  %v141_v30 = vld [vmem:[%s536_s3 + $0x78] sm:$0xff]  ;;  %p387_p0 = scmp.ne.s32.totalorder %s255_s12, %s386_s13  ;;  %p392_p2 = scmp.lt.s32.totalorder %s386_s13, %s386_s13 }
   0xa   :  { %v371_v28 = vpack.c.bf16 %v139_v27, %v138_v26  ;;  %v375_v31 = vpack.c.bf16 %v141_v30, %v140_v29  ;;  %v265_v32 = vld [vmem:[%s535_s2] ss:$0 sm:$0xff] }
   0xb   :  { %354 = vmatpush3.bf16.msra.mxu1 %v351_v12  ;;  %v268_v49 = vld [vmem:[%s537_s4] ss:$0 sm:$0xff]  ;;  %p393_p3 = por %p392_p2, %p391_p1 }
   0xc   :  { %302 = vmatmul.mubr.msk.f32.vlgmr.msra.gmra.mrb[0].mxu0 %vm34_vm0, %v22_v16  ;;  %356 = vmatprep.subr.bf16.mxu1 %v355_v15 }
   0xd   :  { %p394_p4 = pnand %p393_p3, %p387_p0 }
   0xf   :  { %358 = vmatpush3.bf16.msra.mxu1 %v355_v15 }
  0x10   :  { %360 = vmatprep.subr.bf16.mxu1 %v359_v19 }
  0x13   :  { %362 = vmatpush3.bf16.msra.mxu1 %v359_v19 }
  0x14   :  { %364 = vmatprep.subr.bf16.mxu1 %v363_v22 }
  0x17   :  { %366 = vmatpush3.bf16.msra.mxu1 %v363_v22 }
  0x18   :  { %368 = vmatprep.subr.bf16.mxu1 %v367_v25 }
  0x1b   :  { %370 = vmatpush3.bf16.msra.mxu1 %v367_v25 }
  0x1c   :  { %372 = vmatprep.subr.bf16.mxu1 %v371_v28 }
  0x1f   :  { %374 = vmatpush3.bf16.msra.mxu1 %v371_v28 }
  0x20   :  { %376 = vmatprep.subr.bf16.mxu1 %v375_v31 }
  0x23   :  { %378 = vmatpush3.bf16.msra.mxu1 %v375_v31 }
  0xdf   :  { %v303_v33 = vpop.f32.mrb[0].mxu0 }
  0xe0   :  { %v113_v34 = vadd.f32 %v303_v33, %v265_v32  ;;  %v107_v35 = vpop.f32.mrb[1].mxu0 }
  0xe1   :  { %v108_v36 = vadd.f32 %v265_v32, %v107_v35 }
  0xe2   :  { %v119_v37 = vmul.f32 0.70710677, %v113_v34  ;;  %v117_v44 = vmul.f32 0.5, %v113_v34 }
  0xe3   :  { %v118_v38 = vmul.f32 0.70710677, %v108_v36  ;;  %v116_v42 = vmul.f32 0.5, %v108_v36 }
  0xe4   :  { %382 = verf.f32 %v119_v37 }
  0xe5   :  { %384 = verf.f32 %v118_v38 }
  0xee   :  { %v383_v39 = vpop.eup %382 }
  0xef   :  { %v385_v40 = vpop.eup %384  ;;  %v123_v41 = vadd.f32 1.0, %v383_v39 }
  0xf0   :  { %v122_v43 = vadd.f32 1.0, %v385_v40 }
  0xf1   :  { %v125_v46 = vmul.f32 %v123_v41, %v117_v44 }
  0xf2   :  { %v124_v45 = vmul.f32 %v122_v43, %v116_v42 }
  0xf4   :  { %336 = vmatprep.mubr.f32.mxu1 %v124_v45 }
  0xf5   :  { %337 = vmatmul.mubr.f32.vlgmr.msra.gmra.mrb[0].mxu1 %v125_v46 }
 0x1c8   :  { %v338_v47 = vpop.f32.mrb[0].mxu1 }
 0x1c9   :  { %222 = vst.msk [vmem:[#allocation2 + $0x8] sm:$0xff] %vm34_vm0, %v338_v47  ;;  %v208_v48 = vpop.f32.mrb[1].mxu1 }
 0x1ca   :  { %221 = vst.msk [vmem:[#allocation2] sm:$0xff] %vm34_vm0, %v208_v48 }
 0x1d0   :  { %v237_v50 = vld [vmem:[#allocation2 + $0x8] sm:$0xff] }
 0x1d1   :  { %v236_v51 = vld [vmem:[#allocation2] sm:$0xff]  ;;  %v246_v52 = vadd.f32 %v268_v49, %v237_v50 }
 0x1d2   :  { %v245_v53 = vadd.f32 %v268_v49, %v236_v51 }
 0x1d3   :  { %248 = vst.msk [vmem:[#allocation3 + $0x8] sm:$0xff] %vm34_vm0, %v246_v52 }
 0x1d4   :  { %247 = vst.msk [vmem:[#allocation3] sm:$0xff] %vm34_vm0, %v245_v53 }
 0x1d5   :  { %397 = shalt.err (!%p394_p4)
}
 0x1d6   :  { %s398_s15 = scalar_lea.hbm %s538_s5, 256 }
 0x1d7   :  { %p399_p5 = scmp.ne.s32.totalorder %s538_s5, %s398_s15  ;;  %p402_p6 = scmp.lt.u32.totalorder %s398_s15, %s538_s5 }
 0x1d9   :  { %p404_p7 = pnand %p402_p6, %p399_p5 }
 0x1db   :  { %407 = shalt.err (!%p404_p7)
}
 0x1dc   :  { %s411_s20 = smov 128   ;;  %s412_s21 = smov 8  }
 0x1dd   :  { %260 = dma.vmem_to_hbm [thread:$0]  %s255_s12, 256, %s538_s5, [#allocation4], %s411_s20, %s411_s20, %s412_s21  }
 0x1de   :  { %408 = dma.done.wait [#allocation4], 256  }
 0x1df   :  { %409 = vsyncadd [#allocation4], 4294967040 }
 0x1e0   :  { %264 = vsyncpa [#allocation4], 1 }

</bundles_post_ra>
